<compile_context>
chip_gen: v7x
topology: tpu7x:2x2x1
jax: 0.10.0
libtpu: 0.0.40
codegen_flags: <defaults>
</compile_context>

<pallas_src>
import jax
import jax.numpy as jnp
from jax import lax
from jax.experimental import pallas as pl
from jax.experimental.pallas import tpu as pltpu


def _round_up(x, m):
    return ((x + m - 1) // m) * m


def _make_wmp_kernel(*, s_total, seq_tile, inner_chunk, need_seq_mask):
    """Build the kernel body for fixed (static) tiling parameters.

    Block shapes seen by the kernel:
      mask_ref : (tb, ts)     f32   attention mask tile
      pw_ref   : (1, ts)      f32   position weights tile
      tok_ref  : (tb, ts, D)  f32/bf16 token embeddings (native dtype)
      out_ref  : (tb, D)      f32   resident accumulator across the seq axis
      msum_ref : (tb, 1)      f32   VMEM scratch: sum of weights per row
    """
    chunk_starts = tuple(range(0, seq_tile, inner_chunk))

    def kernel(mask_ref, pw_ref, tok_ref, out_ref, msum_ref):
        s_step = pl.program_id(1)

        @pl.when(s_step == 0)
        def _init():
            out_ref[...] = jnp.zeros_like(out_ref)
            msum_ref[...] = jnp.zeros_like(msum_ref)

        # Chunked VPU multiply-accumulate over the sequence axis.  Chunking
        # bounds the live f32-promoted (tb, chunk, D) product; all chunk
        # offsets are static Python ints (no dynamic minor-dim slicing).
        for st in chunk_starts:
            ln = min(inner_chunk, seq_tile - st)
            sl = pl.ds(st, ln)
            wc = mask_ref[:, sl] * pw_ref[:, sl]                    # (tb, ln) f32
            if need_seq_mask:
                # Last seq block may overhang S: overhanging positions hold
                # unspecified data -> force their contribution to exact 0
                # (jnp.where is NaN-safe, unlike multiplying by a 0 mask).
                pos = (s_step * seq_tile + st
                       + lax.broadcasted_iota(jnp.int32, wc.shape, 1))
                valid = pos < s_total
                wc = jnp.where(valid, wc, 0.0)
                prod = wc[:, :, None] * tok_ref[:, sl, :]           # (tb, ln, D) f32
                prod = jnp.where(valid[:, :, None], prod, 0.0)
            else:
                prod = wc[:, :, None] * tok_ref[:, sl, :]           # (tb, ln, D) f32
            out_ref[...] += jnp.sum(prod, axis=1)                   # (tb, D) f32
            msum_ref[...] += jnp.sum(wc, axis=1, keepdims=True)     # (tb, 1) f32

        @pl.when(s_step == pl.num_programs(1) - 1)
        def _finalize():
            denom = jnp.maximum(msum_ref[...], 1e-9)                # torch.clamp(min=1e-9)
            # Exact reciprocal + multiply (approx=True may exceed 1e-5 tol).
            out_ref[...] = out_ref[...] * pl.reciprocal(denom, approx=False)

    return kernel


def _choose_tiles(B, S, D, itemsize, budget, batch_tile, seq_tile):
    """Pick (batch_tile, seq_tile) fitting all double-buffered operands in budget."""

    def footprint(tb, ts):
        tok_b = tb * ts * D * itemsize      # token stream
        msk_b = tb * ts * 4                 # attention mask
        pw_b = ts * 4                       # position weights
        out_b = tb * D * 4                  # resident output block
        scr_b = tb * 128 * 4                # sum-of-weights scratch (lane-padded)
        return 2 * (tok_b + msk_b + pw_b + out_b) + scr_b

    if batch_tile is not None:
        batch_cands = [int(batch_tile)]
    elif B <= 8:
        batch_cands = [B]                   # block dim == full array dim: legal
    else:
        # Multiples of 8; cap so the "parallel" batch axis keeps >= 2 grid
        # steps (Megacore / both TensorCores on v7x) whenever B allows it.
        cap = min((B // 8) * 8, max(8, _round_up(pl.cdiv(B, 2), 8)))
        batch_cands = [c for c in (1024, 512, 256, 128, 64, 32, 16, 8) if c <= cap] or [8]

    if seq_tile is not None:
        seq_cands = [int(seq_tile)]
    else:
        # Full S first (single seq step, no overhang); otherwise 128-multiples
        # so long sequences still fit v7x's 64 MiB VMEM.
        seq_cands = [S] + [c for c in (4096, 2048, 1024, 512, 256, 128) if c < S]

    for ts in seq_cands:
        for tb in batch_cands:
            if footprint(tb, ts) <= budget:
                return tb, ts
    return batch_cands[-1], seq_cands[-1]


def weighted_mean_pooling(token_embeddings, attention_mask, position_weights,
                          *, batch_tile=None, seq_tile=None):
    """JAX/Pallas equivalent of WeightedMeanPooling.forward.

    token_embeddings: (B, S, D) float32 or bfloat16
    attention_mask:   (B, S)    int or float
    position_weights: (num_positions + 1 - position_start,) float
    returns dict with 'sentence_embedding': (B, D) float32
    """
    B, S, D = token_embeddings.shape
    assert position_weights.shape[0] >= S, "not enough position weights"

    # torch forward: self.position_weights[:positions]
    pw = position_weights[:S].astype(jnp.float32).reshape(1, S)
    mask_f = attention_mask.astype(jnp.float32)
    tok = token_embeddings                      # native dtype, NO pad / NO copy
    itemsize = jnp.dtype(tok.dtype).itemsize

    # Per-generation VMEM sizing: v5e/v6e (128 MiB physical) -> 64 MiB scoped,
    # v7x (64 MiB physical) -> 44 MiB scoped.
    try:
        vmem_cap = int(getattr(pltpu.get_tpu_info(), "vmem_capacity_bytes",
                               64 * 1024 * 1024))
    except Exception:
        vmem_cap = 64 * 1024 * 1024
    vmem_limit_bytes = int(min(64 * 1024 * 1024, (vmem_cap * 11) // 16))
    budget = (vmem_limit_bytes * 4) // 5        # headroom for fragments/spill

    tb, ts = _choose_tiles(B, S, D, itemsize, budget, batch_tile, seq_tile)

    # Inner accumulation chunk: ~1 MiB of live f32 product, 8-aligned, and a
    # bounded (static) chunk count so the unrolled loop stays small.
    inner_chunk = max(8, min(ts, ((1 << 20) // max(1, tb * D * 4)) // 8 * 8))
    if pl.cdiv(ts, inner_chunk) > 32:
        inner_chunk = _round_up(pl.cdiv(ts, 32), 8)
    inner_chunk = min(inner_chunk, ts)
    need_seq_mask = (S % ts) != 0

    grid = (pl.cdiv(B, tb), pl.cdiv(S, ts))     # overhang handled, no HBM pad

    kernel = _make_wmp_kernel(s_total=S, seq_tile=ts, inner_chunk=inner_chunk,
                              need_seq_mask=need_seq_mask)

    cost = pl.CostEstimate(
        flops=3 * B * S * D,
        transcendentals=0,
        bytes_accessed=(tok.size * itemsize + mask_f.size * 4
                        + pw.size * 4 + B * D * 4),
    )

    out = pl.pallas_call(
        kernel,
        out_shape=jax.ShapeDtypeStruct((B, D), jnp.float32),
        grid_spec=pltpu.PrefetchScalarGridSpec(
            num_scalar_prefetch=0,
            grid=grid,
            in_specs=[
                pl.BlockSpec((tb, ts), lambda b, s: (b, s)),        # attention mask
                pl.BlockSpec((1, ts), lambda b, s: (0, s)),         # position weights
                pl.BlockSpec((tb, ts, D), lambda b, s: (b, s, 0)),  # token embeddings
            ],
            out_specs=pl.BlockSpec((tb, D), lambda b, s: (b, 0)),   # resident accumulator
            scratch_shapes=[pltpu.VMEM((tb, 1), jnp.float32)],      # sum of weights
        ),
        compiler_params=pltpu.CompilerParams(
            dimension_semantics=("parallel", "arbitrary"),
            vmem_limit_bytes=vmem_limit_bytes,
        ),
        cost_estimate=cost,
    )(mask_f, pw, tok)

    return {
        "token_embeddings": token_embeddings,
        "attention_mask": attention_mask,
        "sentence_embedding": out,
    }


def _reference(token_embeddings, attention_mask, position_weights):
    # Pure-JAX reference mirroring the PyTorch forward exactly.
    te = token_embeddings.astype(jnp.float32)
    S = te.shape[1]
    mask_exp = attention_mask.astype(jnp.float32)[:, :, None]
    pw = position_weights[:S].astype(jnp.float32)[None, :, None]
    w = mask_exp * pw
    sum_emb = jnp.sum(te * w, axis=1)
    sum_mask = jnp.maximum(jnp.sum(w, axis=1), 1e-9)    # torch.clamp(min=1e-9)
    return sum_emb / sum_mask


if __name__ == "__main__":
    # Module config: word_embedding_dimension=32, num_positions=512, position_start=0
    word_embedding_dimension = 32
    num_positions = 512
    position_start = 0

    B, S, D = 2, 8, word_embedding_dimension

    key = jax.random.PRNGKey(0)
    k_tok, k_pw = jax.random.split(key)

    token_embeddings = jax.random.normal(k_tok, (B, S, D), dtype=jnp.float32)

    # attention mask: sequence lengths [8, 5]
    lengths = jnp.array([8, 5], dtype=jnp.int32)
    attention_mask = (jnp.arange(S)[None, :] < lengths[:, None]).astype(jnp.int32)

    # Parameter: default init is all-ones of shape (num_positions + 1 - position_start,).
    # Use deterministic non-trivial values to exercise the weighting path.
    n_w = num_positions + 1 - position_start
    position_weights = 1.0 + 0.1 * jax.random.uniform(k_pw, (n_w,), dtype=jnp.float32)

    features = weighted_mean_pooling(token_embeddings, attention_mask, position_weights)
    emb = jax.block_until_ready(features["sentence_embedding"])

    ref = _reference(token_embeddings, attention_mask, position_weights)
    assert emb.shape == (B, D)
    assert jnp.allclose(emb, ref, atol=1e-5, rtol=1e-5), "mismatch vs reference"

    # TODO(synk): save/load/get_config_dict are file-I/O only and have no kernel equivalent.
    print("KERNEL_OK")
</pallas_src>

<mosaic_0001>
module attributes {stable_mosaic.version = 11 : i64} {
  func.func @kernel(%arg0: i32, %arg1: i32, %arg2: memref<2x8xf32, #tpu.memory_space<vmem>>, %arg3: memref<1x8xf32, #tpu.memory_space<vmem>>, %arg4: memref<2x8x32xf32, #tpu.memory_space<vmem>>, %arg5: memref<2x32xf32, #tpu.memory_space<vmem>>, %arg6: memref<2x1xf32, #tpu.memory_space<vmem>>) attributes {dimension_semantics = [#tpu.dimension_semantics<parallel>, #tpu.dimension_semantics<arbitrary>], iteration_bounds = array<i64: 1, 1>, scalar_prefetch = 0 : i64, scratch_operands = 1 : i64, tpu.core_type = #tpu.core_type<tc>, window_params = [{transform_indices = @transform_0, window_bounds = array<i64: 2, 8>}, {transform_indices = @transform_1, window_bounds = array<i64: 1, 8>}, {transform_indices = @transform_2, window_bounds = array<i64: 2, 8, 32>}, {transform_indices = @transform_3, window_bounds = array<i64: 2, 32>}]} {
    %c0_i32 = arith.constant 0 : i32
    %0 = arith.cmpi eq, %arg1, %c0_i32 : i32
    %1 = arith.extui %0 : i1 to i32
    %c0_i32_0 = arith.constant 0 : i32
    %2 = arith.cmpi ne, %1, %c0_i32_0 : i32
    scf.if %2 {
      %cst_18 = arith.constant 0.000000e+00 : f32
      %23 = vector.broadcast %cst_18 : f32 to vector<2x32xf32>
      %c0_19 = arith.constant 0 : index
      %c0_20 = arith.constant 0 : index
      %24 = vector.load %arg5[%c0_19, %c0_20] : memref<2x32xf32, #tpu.memory_space<vmem>>, vector<2x32xf32>
      tpu.vector_store %arg5[%c0_19, %c0_20], %23 {strides = array<i32>} : memref<2x32xf32, #tpu.memory_space<vmem>>, vector<2x32xf32>,
      %cst_21 = arith.constant 0.000000e+00 : f32
      %25 = vector.broadcast %cst_21 : f32 to vector<2x1xf32>
      %c0_22 = arith.constant 0 : index
      %c0_23 = arith.constant 0 : index
      %26 = vector.load %arg6[%c0_22, %c0_23] : memref<2x1xf32, #tpu.memory_space<vmem>>, vector<2x1xf32>
      tpu.vector_store %arg6[%c0_22, %c0_23], %25 {strides = array<i32>} : memref<2x1xf32, #tpu.memory_space<vmem>>, vector<2x1xf32>,
    } else {
    }
    %c0 = arith.constant 0 : index
    %c0_1 = arith.constant 0 : index
    %3 = vector.load %arg2[%c0, %c0_1] : memref<2x8xf32, #tpu.memory_space<vmem>>, vector<2x8xf32>
    %c0_2 = arith.constant 0 : index
    %c0_3 = arith.constant 0 : index
    %4 = vector.load %arg3[%c0_2, %c0_3] : memref<1x8xf32, #tpu.memory_space<vmem>>, vector<1x8xf32>
    %5 = vector.broadcast %4 : vector<1x8xf32> to vector<2x8xf32>
    %6 = arith.mulf %3, %5 : vector<2x8xf32>
    %7 = vector.shape_cast %6 : vector<2x8xf32> to vector<2x8x1xf32>
    %c0_4 = arith.constant 0 : index
    %c0_5 = arith.constant 0 : index
    %c0_6 = arith.constant 0 : index
    %8 = vector.load %arg4[%c0_4, %c0_5, %c0_6] : memref<2x8x32xf32, #tpu.memory_space<vmem>>, vector<2x8x32xf32>
    %9 = vector.broadcast %7 : vector<2x8x1xf32> to vector<2x8x32xf32>
    %10 = arith.mulf %9, %8 : vector<2x8x32xf32>
    %c0_7 = arith.constant 0 : index
    %c0_8 = arith.constant 0 : index
    %11 = vector.load %arg5[%c0_7, %c0_8] : memref<2x32xf32, #tpu.memory_space<vmem>>, vector<2x32xf32>
    %cst = arith.constant dense<0.000000e+00> : vector<2x32xf32>
    %12 = vector.multi_reduction <add>, %10, %cst [1] : vector<2x8x32xf32> to vector<2x32xf32>
    %13 = arith.addf %11, %12 : vector<2x32xf32>
    %c0_9 = arith.constant 0 : index
    %c0_10 = arith.constant 0 : index
    %14 = vector.load %arg5[%c0_9, %c0_10] : memref<2x32xf32, #tpu.memory_space<vmem>>, vector<2x32xf32>
    tpu.vector_store %arg5[%c0_9, %c0_10], %13 {strides = array<i32>} : memref<2x32xf32, #tpu.memory_space<vmem>>, vector<2x32xf32>,
    %c0_11 = arith.constant 0 : index
    %c0_12 = arith.constant 0 : index
    %15 = vector.load %arg6[%c0_11, %c0_12] : memref<2x1xf32, #tpu.memory_space<vmem>>, vector<2x1xf32>
    %cst_13 = arith.constant dense<0.000000e+00> : vector<2xf32>
    %16 = vector.multi_reduction <add>, %6, %cst_13 [1] : vector<2x8xf32> to vector<2xf32>
    %17 = vector.shape_cast %16 : vector<2xf32> to vector<2x1xf32>
    %18 = arith.addf %15, %17 : vector<2x1xf32>
    %c0_14 = arith.constant 0 : index
    %c0_15 = arith.constant 0 : index
    %19 = vector.load %arg6[%c0_14, %c0_15] : memref<2x1xf32, #tpu.memory_space<vmem>>, vector<2x1xf32>
    tpu.vector_store %arg6[%c0_14, %c0_15], %18 {strides = array<i32>} : memref<2x1xf32, #tpu.memory_space<vmem>>, vector<2x1xf32>,
    %c0_i32_16 = arith.constant 0 : i32
    %20 = arith.cmpi eq, %arg1, %c0_i32_16 : i32
    %21 = arith.extui %20 : i1 to i32
    %c0_i32_17 = arith.constant 0 : i32
    %22 = arith.cmpi ne, %21, %c0_i32_17 : i32
    scf.if %22 {
      %c0_18 = arith.constant 0 : index
      %c0_19 = arith.constant 0 : index
      %23 = vector.load %arg6[%c0_18, %c0_19] : memref<2x1xf32, #tpu.memory_space<vmem>>, vector<2x1xf32>
      %cst_20 = arith.constant 9.99999971E-10 : f32
      %24 = vector.broadcast %cst_20 : f32 to vector<2x1xf32>
      %25 = arith.maximumf %23, %24 : vector<2x1xf32>
      %c0_21 = arith.constant 0 : index
      %c0_22 = arith.constant 0 : index
      %26 = vector.load %arg5[%c0_21, %c0_22] : memref<2x32xf32, #tpu.memory_space<vmem>>, vector<2x32xf32>
      %27 = tpu.reciprocal %25 : vector<2x1xf32> -> vector<2x1xf32>
      %28 = vector.broadcast %27 : vector<2x1xf32> to vector<2x32xf32>
      %29 = arith.mulf %26, %28 : vector<2x32xf32>
      %c0_23 = arith.constant 0 : index
      %c0_24 = arith.constant 0 : index
      %30 = vector.load %arg5[%c0_23, %c0_24] : memref<2x32xf32, #tpu.memory_space<vmem>>, vector<2x32xf32>
      tpu.vector_store %arg5[%c0_23, %c0_24], %29 {strides = array<i32>} : memref<2x32xf32, #tpu.memory_space<vmem>>, vector<2x32xf32>,
    } else {
    }
    return
  }
  func.func @transform_0(%arg0: i32, %arg1: i32) -> (i32, i32) {
    %c0_i32 = arith.constant 0 : i32
    return %arg0, %arg1 : i32, i32
  }
  func.func @transform_1(%arg0: i32, %arg1: i32) -> (i32, i32) {
    %c0_i32 = arith.constant 0 : i32
    %c0_i32_0 = arith.constant 0 : i32
    return %c0_i32, %arg1 : i32, i32
  }
  func.func @transform_2(%arg0: i32, %arg1: i32) -> (i32, i32, i32) {
    %c0_i32 = arith.constant 0 : i32
    %c0_i32_0 = arith.constant 0 : i32
    return %arg0, %arg1, %c0_i32 : i32, i32, i32
  }
  func.func @transform_3(%arg0: i32, %arg1: i32) -> (i32, i32) {
    %c0_i32 = arith.constant 0 : i32
    %c0_i32_0 = arith.constant 0 : i32
    return %arg0, %c0_i32 : i32, i32
  }
}

</mosaic_0001>

<bundles_post_ra>
// kernel: tpu_custom_call.1
= control target key start
LH: loop header
LB: loop body
LE: loop exit
PB: predicated region body
PF: predicated region fallthrough
CT: control target
= control target key end

     0   :  { %8 = vsyncpa [#allocation4], 0  ;;  %s300_s0 = inlined_call_operand.hbm [shape: f32[2,8], index: 0, kind: input, shape index: {}]   ;;  %s301_s1 = inlined_call_operand.vmem [shape: f32[1,8], index: 1, kind: input, shape index: {}]   ;;  %s302_s2 = inlined_call_operand.hbm [shape: f32[2,8,32], index: 2, kind: input, shape index: {}]   ;;  %s303_s3 = inlined_call_operand.hbm [shape: f32[2,32], index: 3, kind: output, shape index: {}]  }
   0x1   :  { %9 = vsyncpa [#allocation7], 0 }
   0x2   :  { %10 = vsyncpa [#allocation5], 0  ;;  %s222_s12 = smov [#allocation3]   ;;  %s223_s14 = smov [#allocation6]  }
   0x3   :  { %s17_s13 = sshll.u32 %s222_s12, 4  ;;  %s28_s15 = sshll.u32 %s223_s14, 4  ;;  %s18_s13 = int_to_ptr.vmem [resolvable:$true] %s17_s13  ;;  %s249_s15 = int_to_ptr.vmem [resolvable:$true] %s28_s15 }
   0x4   :  { %s150_s18 = scalar_lea.hbm %s300_s0, 32 }
   0x5   :  { %p151_p0 = scmp.ne.s32.totalorder %s300_s0, %s150_s18  ;;  %p154_p1 = scmp.lt.u32.totalorder %s150_s18, %s300_s0 }
   0x7   :  { %p156_p2 = pnand %p154_p1, %p151_p0 }
   0x9   :  { %159 = shalt.err (!%p156_p2)
}
   0xa   :  { %s160_s23 = scalar_lea.vmem %s18_s13, 32  ;;  %p165_p4 = scmp.lt.s32.totalorder %s18_s13, %s18_s13 }
   0xb   :  { %p161_p3 = scmp.ne.s32.totalorder %s18_s13, %s160_s23  ;;  %p166_p5 = scmp.lt.s32.totalorder %s160_s23, %s160_s23 }
   0xd   :  { %p167_p6 = por %p166_p5, %p165_p4 }
   0xf   :  { %p168_p7 = pnand %p167_p6, %p161_p3 }
  0x11   :  { %171 = shalt.err (!%p168_p7)
}
  0x12   :  { %20 = dma.hbm_to_vmem [thread:$0]  %s300_s0, 32, %s18_s13, [#allocation4]  }
  0x13   :  { %s172_s28 = scalar_lea.hbm %s302_s2, 256 }
  0x14   :  { %p173_p8 = scmp.ne.s32.totalorder %s302_s2, %s172_s28  ;;  %p176_p9 = scmp.lt.u32.totalorder %s172_s28, %s302_s2 }
  0x16   :  { %p178_p10 = pnand %p176_p9, %p173_p8 }
  0x18   :  { %181 = shalt.err (!%p178_p10)
}
  0x19   :  { %s182_s6 = scalar_lea.vmem %s249_s15, 256  ;;  %p187_p12 = scmp.lt.s32.totalorder %s249_s15, %s249_s15 }
  0x1a   :  { %p183_p11 = scmp.ne.s32.totalorder %s249_s15, %s182_s6  ;;  %p188_p13 = scmp.lt.s32.totalorder %s182_s6, %s182_s6 }
  0x1c   :  { %p189_p0 = por %p188_p13, %p187_p12 }
  0x1e   :  { %p190_p1 = pnand %p189_p0, %p183_p11 }
  0x20   :  { %193 = shalt.err (!%p190_p1)
}
  0x21   :  { %s224_s0 = smov 128   ;;  %s225_s7 = smov 8  }
  0x22   :  { %34 = dma.hbm_to_vmem [thread:$0]  %s302_s2, 256, %s249_s15, [#allocation7], %s224_s0, %s224_s0, %s225_s7  }
  0x23   :  { %216 = dma.done.wait [#allocation4], 32  }
  0x24   :  { %217 = vsyncadd [#allocation4], 4294967264 }
  0x25   :  { %218 = dma.done.wait [#allocation7], 256  }
  0x26   :  { %219 = vsyncadd [#allocation7], 4294967040  ;;  %vm47_vm0 = vcmask 1024   ;;  %v226_v0 = vmov 0.0   ;;  %v49_v1 = vld [vmem:[#allocation3] sm:$0x3]  ;;  %v58_v5 = vlaneseq }
  0x27   :  { %48 = vst.msk [vmem:[#allocation2] sm:$0x3] %vm47_vm0, %v226_v0  ;;  %v138_v2 = vld [vmem:[%s301_s1] ss:$0 sm:$0xff]  ;;  %vm101_vm1 = vcmask 58368   ;;  %v227_v10 = vmov 0  }
  0x28   :  { %v57_v3 = vmul.f32 %v138_v2, %v49_v1  ;;  %v59_v6 = vshrl.u32 %v58_v5, 7  ;;  %146 = vset.pattern.permute.xlu1 %v227_v10  ;;  %147 = vset.pattern.permute.xlu0 %v227_v10  ;;  %vm45_vm2 = vcmask 254976   ;;  %v73_v12 = vld [vmem:[#allocation6 + $0x8] sm:$0xff]  ;;  %vm77_vm3 = vcmask 261120   ;;  %v72_v21 = vld [vmem:[#allocation6] sm:$0xff]  ;;  %s228_s1 = smov [#allocation8]  }
  0x29   :  { %46 = vst.msk [vmem:[#allocation8] sm:$0x3] %vm45_vm2, %v226_v0  ;;  %vm94_vm4 = vcmask 1041409   ;;  %s128_s2 = sshll.u32 %s228_s1, 4  ;;  %s129_s2 = int_to_ptr.vmem [resolvable:$true] %s128_s2 }
  0x2a   :  { %v102_v4 = vsel %vm101_vm1, %v57_v3, 0.0  ;;  %v67_v7 = vsub.s32 1, %v59_v6  ;;  %v60_v8 = vsub.s32 0, %v59_v6  ;;  %s194_s12 = scalar_lea.vmem %s129_s2, 32  ;;  %p199_p3 = scmp.lt.s32.totalorder %s129_s2, %s129_s2 }
  0x2b   :  { %103 = vadd.xlane.f32.xlu0 %v102_v4  ;;  %p195_p2 = scmp.ne.s32.totalorder %s129_s2, %s194_s12  ;;  %p200_p4 = scmp.lt.s32.totalorder %s194_s12, %s194_s12 }
  0x2c   :  { %v68_v9 = vrot.slane %v57_v3, %v67_v7  ;;  %v61_v11 = vrot.slane %v57_v3, %v60_v8 }
  0x2d   :  { %p201_p5 = por %p200_p4, %p199_p3 }
  0x2e   :  { %70 = vbcast.lane.b32.xlu1 %v68_v9, 256  ;;  %v100_v17 = vld [vmem:[#allocation2] sm:$0x3] }
  0x2f   :  { %p202_p6 = pnand %p201_p5, %p195_p2 }
  0x30   :  { %v76_v36 = vld [vmem:[#allocation8] sm:$0x3] }
  0x41   :  { %63 = vbcast.lane.b32.xlu0 %v61_v11, 256 }
  0xa0   :  { %v71_v13 = vpop.permute.xlu1 %70 }
  0xa1   :  { %v75_v14 = vmul.f32 %v73_v12, %v71_v13 }
  0xa3   :  { %v85_v15 = vsel %vm77_vm3, %v75_v14, 0.0 }
  0xa4   :  { %v86_v16 = vrot.slane %v85_v15, 4 }
  0xa6   :  { %v87_v19 = vadd.f32 %v86_v16, %v85_v15 }
  0xa8   :  { %v88_v22 = vrot.slane %v87_v19, 2 }
  0xaa   :  { %v89_v26 = vadd.f32 %v88_v22, %v87_v19 }
  0xac   :  { %v90_v31 = vrot.slane %v89_v26, 1 }
  0xae   :  { %v91_v34 = vadd.f32 %v90_v31, %v89_v26 }
  0xb8   :  { %v104_v18 = vpop.xlane.xlu0 %103 }
  0xb9   :  { %v105_v20 = vadd.f32 %v104_v18, %v100_v17 }
  0xbb   :  { %107 = vst.msk [vmem:[#allocation2] sm:$0x3] %vm47_vm0, %v105_v20 }
  0xbc   :  { %v64_v23 = vpop.permute.xlu0 %63 }
  0xbd   :  { %v74_v24 = vmul.f32 %v72_v21, %v64_v23 }
  0xbf   :  { %v78_v25 = vsel %vm77_vm3, %v74_v24, 0.0 }
  0xc0   :  { %v79_v27 = vrot.slane %v78_v25, 4 }
  0xc2   :  { %v111_v28 = vld [vmem:[#allocation2] sm:$0x3]  ;;  %v80_v29 = vadd.f32 %v79_v27, %v78_v25 }
  0xc3   :  { %v112_v30 = vmax.f32 %v111_v28, 1e-09 }
  0xc4   :  { %v81_v32 = vrot.slane %v80_v29, 2 }
  0xc5   :  { %148 = vrcp.f32 %v112_v30 }
  0xc6   :  { %v82_v33 = vadd.f32 %v81_v32, %v80_v29 }
  0xc8   :  { %v83_v35 = vrot.slane %v82_v33, 1 }
  0xca   :  { %v84_v37 = vadd.f32 %v83_v35, %v82_v33 }
  0xcc   :  { %v95_v38 = vsel %vm94_vm4, %v91_v34, %v84_v37 }
  0xcd   :  { %v97_v39 = vadd.f32 %v95_v38, %v76_v36 }
  0xcf   :  { %v149_v40 = vpop.eup %148  ;;  %99 = vst.msk [vmem:[#allocation8] sm:$0x3] %vm45_vm2, %v97_v39 }
  0xd0   :  { %117 = vperm.xlu1 %146, %v149_v40  }
  0xd6   :  { %v113_v42 = vld [vmem:[#allocation8] sm:$0x3] }
 0x14f   :  { %v118_v41 = vpop.permute.xlu1 %117 }
 0x150   :  { %v120_v43 = vmul.f32 %v118_v41, %v113_v42 }
 0x152   :  { %121 = vst.msk [vmem:[#allocation8] sm:$0x3] %vm45_vm2, %v120_v43 }
 0x153   :  { %205 = shalt.err (!%p202_p6)
}
 0x154   :  { %s206_s15 = scalar_lea.hbm %s303_s3, 32 }
 0x155   :  { %p207_p7 = scmp.ne.s32.totalorder %s303_s3, %s206_s15  ;;  %p210_p8 = scmp.lt.u32.totalorder %s206_s15, %s303_s3 }
 0x157   :  { %p212_p9 = pnand %p210_p8, %p207_p7 }
 0x159   :  { %215 = shalt.err (!%p212_p9)
}
 0x15a   :  { %131 = dma.vmem_to_hbm [thread:$0]  %s129_s2, 32, %s303_s3, [#allocation5]  }
 0x15b   :  { %220 = dma.done.wait [#allocation5], 32  }
 0x15c   :  { %221 = vsyncadd [#allocation5], 4294967264 }
 0x15d   :  { %135 = vsyncpa [#allocation4], 1 }
 0x15e   :  { %136 = vsyncpa [#allocation7], 1 }
 0x15f   :  { %137 = vsyncpa [#allocation5], 1 }

</bundles_post_ra>
